<compile_context>
chip_gen: v7x
topology: tpu7x:2x2x1
jax: 0.10.0
libtpu: 0.0.40
codegen_flags: <defaults>
</compile_context>

<pallas_src>
import math
import jax
import jax.numpy as jnp
from jax.experimental import pallas as pl
from jax.experimental.pallas import tpu as pltpu

SUBLANE = 8  # f32 sublane granularity: batch tiles rounded to multiples of 8


def _round_up(x, m):
    return ((x + m - 1) // m) * m


def fc_block_kernel(x_ref, w1_ref, b1_ref, w2_ref, b2_ref, w3_ref, b3_ref, o_ref):
    """Fused 3-layer MLP on one batch tile: f32 MXU matmuls with f32 accumulation;
    the hidden activations never leave VMEM/vregs (no HBM round-trips)."""
    h = jnp.dot(x_ref[...], w1_ref[...], preferred_element_type=jnp.float32) + b1_ref[...]
    h = jnp.maximum(h, 0.0)
    h = jnp.dot(h, w2_ref[...], preferred_element_type=jnp.float32) + b2_ref[...]
    h = jnp.maximum(h, 0.0)
    o_ref[...] = (jnp.dot(h, w3_ref[...], preferred_element_type=jnp.float32)
                  + b3_ref[...]).astype(o_ref.dtype)


def _physical_vmem_bytes():
    try:
        return int(pltpu.get_tpu_info().vmem_capacity_bytes)
    except Exception:
        return 64 * 1024 * 1024   # conservative (v7x-sized) fallback


def fc_block(x, params, *, tile_b=512):
    """FCBlock forward.  x: (..., d_in) float32.  Tiles only over the (flattened)
    batch axis; all feature dims stay at their natural (unpadded) sizes and the
    weights/biases stay VMEM-resident (constant index_map)."""
    w1, b1, w2, b2, w3, b3 = params
    d_in, h0 = w1.shape
    h1, d_out = w2.shape[1], w3.shape[1]

    lead_shape = x.shape[:-1]
    x2 = x.reshape(-1, d_in)
    B = x2.shape[0]

    # Batch tiling: large tiles amortise the ~0.35us/step grid overhead, but keep
    # grid >= 2 so the "parallel" batch axis can shard across both v7x TensorCores.
    if B > SUBLANE:
        grid_n = max(2, pl.cdiv(B, tile_b))
    else:
        grid_n = 1
    tile_b = _round_up(pl.cdiv(B, grid_n), SUBLANE)
    B_p = grid_n * tile_b

    if B_p != B:  # zero-pad ragged batch; padded rows are sliced off below
        x2 = jnp.zeros((B_p, d_in), x2.dtype).at[:B].set(x2)

    # VMEM budget from the actual block shapes: double-buffered x/out tiles,
    # resident f32 weights/biases (x2 for the default pipeline's buffering),
    # plus headroom for the two intermediate activation tiles.
    param_bytes = 4 * (w1.size + b1.size + w2.size + b2.size + w3.size + b3.size)
    vmem_need = (2 * tile_b * d_in * 4
                 + 2 * tile_b * d_out * 4
                 + 2 * param_bytes
                 + 2 * tile_b * (h0 + h1) * 4)
    vmem_cap = (7 * _physical_vmem_bytes()) // 8          # ~112 MiB v5e/v6e, ~56 MiB v7x
    vmem_limit = int(min(vmem_cap, max(8 * vmem_need, 32 * 1024 * 1024)))

    flops = 2 * B_p * (d_in * h0 + h0 * h1 + h1 * d_out)
    bytes_accessed = int(4 * B_p * (d_in + d_out) + param_bytes)

    # TODO(synk): for hidden dims where the resident f32 weights no longer fit in
    # VMEM (threshold halves on v7x), add a K/N-tiled path (extra "arbitrary" grid
    # axis + f32 VMEM accumulator, or pl.Buffered(1) weight specs); unnecessary here.
    out_p = pl.pallas_call(
        fc_block_kernel,
        out_shape=jax.ShapeDtypeStruct((B_p, d_out), jnp.float32),
        grid_spec=pl.GridSpec(
            grid=(grid_n,),
            in_specs=[
                # batch tile of the input (last dim == full array dim -> legal)
                pl.BlockSpec((tile_b, d_in), lambda i: (i, 0)),
                # weights / biases: full arrays, constant index_map -> DMA'd once,
                # kept resident across grid steps
                pl.BlockSpec((d_in, h0), lambda i: (0, 0)),
                pl.BlockSpec((1, h0), lambda i: (0, 0)),
                pl.BlockSpec((h0, h1), lambda i: (0, 0)),
                pl.BlockSpec((1, h1), lambda i: (0, 0)),
                pl.BlockSpec((h1, d_out), lambda i: (0, 0)),
                pl.BlockSpec((1, d_out), lambda i: (0, 0)),
            ],
            out_specs=pl.BlockSpec((tile_b, d_out), lambda i: (i, 0)),
        ),
        compiler_params=pltpu.CompilerParams(
            dimension_semantics=("parallel",),
            vmem_limit_bytes=vmem_limit,
        ),
        cost_estimate=pl.CostEstimate(
            flops=flops, transcendentals=0, bytes_accessed=bytes_accessed),
    )(x2, w1, b1, w2, b2, w3, b3)

    out = out_p[:B] if B_p != B else out_p
    return out.reshape(*lead_shape, d_out)


def init_fc_params(key, input_dim, hidden_dims, output_dim):
    """Deterministic init mimicking nn.Linear's default U(-1/sqrt(fan_in), 1/sqrt(fan_in)).
    Weights stored as (in, out) (transposed vs. PyTorch's (out, in)); biases as (1, out)."""
    dims = [input_dim, hidden_dims[0], hidden_dims[1], output_dim]
    params = []
    keys = jax.random.split(key, 6)
    for li in range(3):
        fan_in, fan_out = dims[li], dims[li + 1]
        bound = 1.0 / math.sqrt(fan_in)
        w = jax.random.uniform(keys[2 * li], (fan_in, fan_out),
                               minval=-bound, maxval=bound, dtype=jnp.float32)
        b = jax.random.uniform(keys[2 * li + 1], (1, fan_out),
                               minval=-bound, maxval=bound, dtype=jnp.float32)
        params += [w, b]
    return tuple(params)


def fc_block_ref(x, params):
    """Pure-JAX f32 reference for correctness checking."""
    w1, b1, w2, b2, w3, b3 = params
    h = jnp.maximum(x @ w1 + b1, 0.0)
    h = jnp.maximum(h @ w2 + b2, 0.0)
    return h @ w3 + b3


if __name__ == "__main__":
    key = jax.random.PRNGKey(0)
    k_x, k_p = jax.random.split(key)

    B, input_dim = 256, 32
    hidden_dims = (64, 32)
    output_dim = 10

    x = jax.random.normal(k_x, (B, input_dim), dtype=jnp.float32)
    params = init_fc_params(k_p, input_dim, hidden_dims, output_dim)

    fwd = jax.jit(fc_block, static_argnames=("tile_b",))
    out = jax.block_until_ready(fwd(x, params))   # grid=(2,): both v7x TCs get work

    ref = fc_block_ref(x, params)
    assert out.shape == (B, output_dim)
    # f32 operands + f32 accumulation: typically ~1e-6-level error vs. the f32
    # reference; tolerance leaves slack for backend default matmul-precision.
    assert jnp.allclose(out, ref, atol=2e-2, rtol=2e-2), "mismatch vs reference"

    print("KERNEL_OK")
</pallas_src>

<mosaic_0001>
module attributes {stable_mosaic.version = 11 : i64} {
  func.func @fc_block_kernel(%arg0: i32, %arg1: memref<128x32xf32, #tpu.memory_space<vmem>>, %arg2: memref<32x64xf32, #tpu.memory_space<vmem>>, %arg3: memref<1x64xf32, #tpu.memory_space<vmem>>, %arg4: memref<64x32xf32, #tpu.memory_space<vmem>>, %arg5: memref<1x32xf32, #tpu.memory_space<vmem>>, %arg6: memref<32x10xf32, #tpu.memory_space<vmem>>, %arg7: memref<1x10xf32, #tpu.memory_space<vmem>>, %arg8: memref<128x10xf32, #tpu.memory_space<vmem>>) attributes {dimension_semantics = [#tpu.dimension_semantics<parallel>], iteration_bounds = array<i64: 2>, scalar_prefetch = 0 : i64, scratch_operands = 0 : i64, tpu.core_type = #tpu.core_type<tc>, window_params = [{transform_indices = @transform_0, window_bounds = array<i64: 128, 32>}, {pipeline_mode = #tpu.pipeline_mode<synchronous>, transform_indices = @transform_1, window_bounds = array<i64: 32, 64>}, {pipeline_mode = #tpu.pipeline_mode<synchronous>, transform_indices = @transform_2, window_bounds = array<i64: 1, 64>}, {pipeline_mode = #tpu.pipeline_mode<synchronous>, transform_indices = @transform_3, window_bounds = array<i64: 64, 32>}, {pipeline_mode = #tpu.pipeline_mode<synchronous>, transform_indices = @transform_4, window_bounds = array<i64: 1, 32>}, {pipeline_mode = #tpu.pipeline_mode<synchronous>, transform_indices = @transform_5, window_bounds = array<i64: 32, 10>}, {pipeline_mode = #tpu.pipeline_mode<synchronous>, transform_indices = @transform_6, window_bounds = array<i64: 1, 10>}, {transform_indices = @transform_7, window_bounds = array<i64: 128, 10>}]} {
    %c0 = arith.constant 0 : index
    %c0_0 = arith.constant 0 : index
    %0 = vector.load %arg1[%c0, %c0_0] : memref<128x32xf32, #tpu.memory_space<vmem>>, vector<128x32xf32>
    %c0_1 = arith.constant 0 : index
    %c0_2 = arith.constant 0 : index
    %1 = vector.load %arg2[%c0_1, %c0_2] : memref<32x64xf32, #tpu.memory_space<vmem>>, vector<32x64xf32>
    %cst = arith.constant dense<0.000000e+00> : vector<128x64xf32>
    %2 = tpu.matmul %0, %1, %cst {dimension_numbers = #tpu.dot_dimension_numbers<[1], [0], [0], [1], [0, 0, 1, 1], [], []>} : vector<128x32xf32>, vector<32x64xf32>, vector<128x64xf32> -> vector<128x64xf32>
    %c0_3 = arith.constant 0 : index
    %c0_4 = arith.constant 0 : index
    %3 = vector.load %arg3[%c0_3, %c0_4] : memref<1x64xf32, #tpu.memory_space<vmem>>, vector<1x64xf32>
    %4 = vector.broadcast %3 : vector<1x64xf32> to vector<128x64xf32>
    %5 = arith.addf %2, %4 : vector<128x64xf32>
    %cst_5 = arith.constant 0.000000e+00 : f32
    %6 = vector.broadcast %cst_5 : f32 to vector<128x64xf32>
    %7 = arith.maximumf %5, %6 : vector<128x64xf32>
    %c0_6 = arith.constant 0 : index
    %c0_7 = arith.constant 0 : index
    %8 = vector.load %arg4[%c0_6, %c0_7] : memref<64x32xf32, #tpu.memory_space<vmem>>, vector<64x32xf32>
    %cst_8 = arith.constant dense<0.000000e+00> : vector<128x32xf32>
    %9 = tpu.matmul %7, %8, %cst_8 {dimension_numbers = #tpu.dot_dimension_numbers<[1], [0], [0], [1], [0, 0, 1, 1], [], []>} : vector<128x64xf32>, vector<64x32xf32>, vector<128x32xf32> -> vector<128x32xf32>
    %c0_9 = arith.constant 0 : index
    %c0_10 = arith.constant 0 : index
    %10 = vector.load %arg5[%c0_9, %c0_10] : memref<1x32xf32, #tpu.memory_space<vmem>>, vector<1x32xf32>
    %11 = vector.broadcast %10 : vector<1x32xf32> to vector<128x32xf32>
    %12 = arith.addf %9, %11 : vector<128x32xf32>
    %cst_11 = arith.constant 0.000000e+00 : f32
    %13 = vector.broadcast %cst_11 : f32 to vector<128x32xf32>
    %14 = arith.maximumf %12, %13 : vector<128x32xf32>
    %c0_12 = arith.constant 0 : index
    %c0_13 = arith.constant 0 : index
    %15 = vector.load %arg6[%c0_12, %c0_13] : memref<32x10xf32, #tpu.memory_space<vmem>>, vector<32x10xf32>
    %cst_14 = arith.constant dense<0.000000e+00> : vector<128x10xf32>
    %16 = tpu.matmul %14, %15, %cst_14 {dimension_numbers = #tpu.dot_dimension_numbers<[1], [0], [0], [1], [0, 0, 1, 1], [], []>} : vector<128x32xf32>, vector<32x10xf32>, vector<128x10xf32> -> vector<128x10xf32>
    %c0_15 = arith.constant 0 : index
    %c0_16 = arith.constant 0 : index
    %17 = vector.load %arg7[%c0_15, %c0_16] : memref<1x10xf32, #tpu.memory_space<vmem>>, vector<1x10xf32>
    %18 = vector.broadcast %17 : vector<1x10xf32> to vector<128x10xf32>
    %19 = arith.addf %16, %18 : vector<128x10xf32>
    %c0_17 = arith.constant 0 : index
    %c0_18 = arith.constant 0 : index
    %20 = vector.load %arg8[%c0_17, %c0_18] : memref<128x10xf32, #tpu.memory_space<vmem>>, vector<128x10xf32>
    tpu.vector_store %arg8[%c0_17, %c0_18], %19 {strides = array<i32>} : memref<128x10xf32, #tpu.memory_space<vmem>>, vector<128x10xf32>,
    return
  }
  func.func @transform_0(%arg0: i32) -> (i32, i32) {
    %c0_i32 = arith.constant 0 : i32
    %c0_i32_0 = arith.constant 0 : i32
    return %arg0, %c0_i32 : i32, i32
  }
  func.func @transform_1(%arg0: i32) -> (i32, i32) {
    %c0_i32 = arith.constant 0 : i32
    %c0_i32_0 = arith.constant 0 : i32
    %c0_i32_1 = arith.constant 0 : i32
    return %c0_i32, %c0_i32_0 : i32, i32
  }
  func.func @transform_2(%arg0: i32) -> (i32, i32) {
    %c0_i32 = arith.constant 0 : i32
    %c0_i32_0 = arith.constant 0 : i32
    %c0_i32_1 = arith.constant 0 : i32
    return %c0_i32, %c0_i32_0 : i32, i32
  }
  func.func @transform_3(%arg0: i32) -> (i32, i32) {
    %c0_i32 = arith.constant 0 : i32
    %c0_i32_0 = arith.constant 0 : i32
    %c0_i32_1 = arith.constant 0 : i32
    return %c0_i32, %c0_i32_0 : i32, i32
  }
  func.func @transform_4(%arg0: i32) -> (i32, i32) {
    %c0_i32 = arith.constant 0 : i32
    %c0_i32_0 = arith.constant 0 : i32
    %c0_i32_1 = arith.constant 0 : i32
    return %c0_i32, %c0_i32_0 : i32, i32
  }
  func.func @transform_5(%arg0: i32) -> (i32, i32) {
    %c0_i32 = arith.constant 0 : i32
    %c0_i32_0 = arith.constant 0 : i32
    %c0_i32_1 = arith.constant 0 : i32
    return %c0_i32, %c0_i32_0 : i32, i32
  }
  func.func @transform_6(%arg0: i32) -> (i32, i32) {
    %c0_i32 = arith.constant 0 : i32
    %c0_i32_0 = arith.constant 0 : i32
    %c0_i32_1 = arith.constant 0 : i32
    return %c0_i32, %c0_i32_0 : i32, i32
  }
  func.func @transform_7(%arg0: i32) -> (i32, i32) {
    %c0_i32 = arith.constant 0 : i32
    %c0_i32_0 = arith.constant 0 : i32
    return %arg0, %c0_i32 : i32, i32
  }
}

</mosaic_0001>

<bundles_post_ra>
// kernel: fc_block.1
= control target key start
LH: loop header
LB: loop body
LE: loop exit
PB: predicated region body
PF: predicated region fallthrough
CT: control target
= control target key end

     0   :  { %s1343_s24 = smov 0   ;;  %s1524_s0 = inlined_call_operand.vmem [shape: f32[256,32], index: 0, kind: input, shape index: {}]   ;;  %s1525_s1 = inlined_call_operand.vmem [shape: f32[32,64], index: 1, kind: input, shape index: {}]   ;;  %s1526_s2 = inlined_call_operand.vmem [shape: f32[1,64], index: 2, kind: input, shape index: {}]   ;;  %s1527_s3 = inlined_call_operand.vmem [shape: f32[64,32], index: 3, kind: input, shape index: {}]   ;;  %s1528_s4 = inlined_call_operand.vmem [shape: f32[1,32], index: 4, kind: input, shape index: {}]   ;;  %s1529_s5 = inlined_call_operand.vmem [shape: f32[32,10], index: 5, kind: input, shape index: {}]   ;;  %s1530_s6 = inlined_call_operand.vmem [shape: f32[1,10], index: 6, kind: input, shape index: {}]   ;;  %s1531_s7 = inlined_call_operand.vmem [shape: f32[256,10], index: 7, kind: output, shape index: {}]  }
   0x1 LB: > { %s1021_s25 = sadd.s32 4294967295, %s1301_s24   ;;  %p1025_p0 = scmp.ge.s32.totalorder %s1301_s24, 1  ;;  %s1301_s24 = sphi %s1343_s24, %s17_s24  }
   0x2   : > { %p238_p1 = scmp.lt.s32.totalorder %s1301_s24, 3 }
   0x4   : > { %p239_p2 = pnand %p1025_p0, %p238_p1 }
   0x5   : > { %v298_v0 = vld [vmem:[%s1525_s1] sm:$0xff] (!%p239_p2)  ;;  %v299_v1 = vld [vmem:[%s1525_s1 + $0x8] sm:$0xff] (!%p239_p2)  ;;  %v300_v2 = vld [vmem:[%s1525_s1 + $0x10] sm:$0xff] (!%p239_p2)  ;;  %s1026_s9 = sshll.u32 (!%p239_p2), %s1021_s25, 4  ;;  %vm309_vm0 = vcmask (!%p239_p2), 261120   ;;  %vm534_vm1 = vcmask (!%p239_p2), 523264  }
   0x6   : > { %242 = sbr.rel (%p239_p2) target bundleno = 698 (0x2ba), region = 48  ;;  %v1251_v3 = vpack.c.bf16 (!%p239_p2), %v299_v1, %v298_v0  ;;  %v301_v4 = vld [vmem:[%s1525_s1 + $0x18] sm:$0xff] (!%p239_p2)  ;;  %p271_p3 = scmp.lt.s32.totalorder (!%p239_p2), %s1026_s9, 31  ;;  %v519_v6 = vld [vmem:[%s1527_s3] sm:$0xff] (!%p239_p2)  ;;  %v520_v7 = vld [vmem:[%s1527_s3 + $0x8] sm:$0xff] (!%p239_p2)  ;;  %vm948_vm2 = vcmask (!%p239_p2), 80896  }
   0x7   : > { %v1255_v5 = vpack.c.bf16 (!%p239_p2), %v301_v4, %v300_v2  ;;  %v1259_v8 = vpack.c.bf16 (!%p239_p2), %v520_v7, %v519_v6  ;;  %v521_v10 = vld [vmem:[%s1527_s3 + $0x10] sm:$0xff] (!%p239_p2)  ;;  %v522_v11 = vld [vmem:[%s1527_s3 + $0x18] sm:$0xff] (!%p239_p2)  ;;  %v523_v18 = vld [vmem:[%s1527_s3 + $0x20] sm:$0xff] (!%p239_p2) }
   0x8   : > { %1252 = vmatprep.subr.bf16.mxu0 (!%p239_p2), %v1251_v3  ;;  %1283 = vmatprep.subr.bf16.mxu1 (!%p239_p2), %v1251_v3  ;;  %v1263_v17 = vpack.c.bf16 (!%p239_p2), %v522_v11, %v521_v10  ;;  %v524_v19 = vld [vmem:[%s1527_s3 + $0x28] sm:$0xff] (!%p239_p2)  ;;  %v525_v31 = vld [vmem:[%s1527_s3 + $0x30] sm:$0xff] (!%p239_p2)  ;;  %v526_v32 = vld [vmem:[%s1527_s3 + $0x38] sm:$0xff] (!%p239_p2) }
   0x9   : > { %1254 = vmatpush3.bf16.msra.mxu0 (!%p239_p2), %v1251_v3  ;;  %1285 = vmatpush3.bf16.msra.mxu1 (!%p239_p2), %v1251_v3  ;;  %v1267_v24 = vpack.c.bf16 (!%p239_p2), %v524_v19, %v523_v18  ;;  %v1271_v33 = vpack.c.bf16 (!%p239_p2), %v526_v32, %v525_v31  ;;  %v744_v34 = vld [vmem:[%s1529_s5] sm:$0xff] (!%p239_p2)  ;;  %v745_v35 = vld [vmem:[%s1529_s5 + $0x8] sm:$0xff] (!%p239_p2)  ;;  %v746_v36 = vld [vmem:[%s1529_s5 + $0x10] sm:$0xff] (!%p239_p2) }
   0xa   : > { %1256 = vmatprep.subr.bf16.mxu0 (!%p239_p2), %v1255_v5  ;;  %1284 = vmatprep.subr.bf16.mxu1 (!%p239_p2), %v1255_v5  ;;  %v1275_v37 = vpack.c.bf16 (!%p239_p2), %v745_v35, %v744_v34  ;;  %v747_v38 = vld [vmem:[%s1529_s5 + $0x18] sm:$0xff] (!%p239_p2)  ;;  %v1030_v40 = vld [vmem:[%s1526_s2] ss:$0 sm:$0xff] (!%p239_p2) }
   0xb   : > { %v1279_v39 = vpack.c.bf16 (!%p239_p2), %v747_v38, %v746_v36 }
   0xd   : > { %s1533_s9 = smov (!%p271_p3, %s1026_s9), 31  ;;  %1258 = vmatpush3.bf16.msra.mxu0 %v1255_v5  ;;  %1286 = vmatpush3.bf16.msra.mxu1 %v1255_v5 }
   0xe   : > { %s1027_s16 = sshll.u32 %s1533_s9, 3  ;;  %1260 = vmatprep.subr.bf16.mxu1 %v1259_v8  ;;  %1276 = vmatprep.subr.bf16.mxu0 %v1275_v37 }
   0xf   : > { %s1377_s19 = scalar_lea.vmem %s1524_s0, %s1027_s16  ;;  %s1487_s29 = scalar_lea.vmem %s1531_s7, %s1027_s16 }
  0x10   : > { %v282_v9 = vld [vmem:[%s1377_s19] sm:$0xff]  ;;  %v283_v12 = vld [vmem:[%s1377_s19 + $0x8] sm:$0xff]  ;;  %v284_v13 = vld [vmem:[%s1377_s19 + $0x10] sm:$0xff] }
  0x11   : > { %1155 = vmatprep.mubr.msk.f32.mxu0 %vm309_vm0, %v282_v9  ;;  %v290_v14 = vld [vmem:[%s1377_s19 + $0x40] sm:$0xff]  ;;  %v291_v15 = vld [vmem:[%s1377_s19 + $0x48] sm:$0xff]  ;;  %v292_v16 = vld [vmem:[%s1377_s19 + $0x50] sm:$0xff] }
  0x12   : > { %1167 = vmatprep.mubr.msk.f32.mxu1 %vm309_vm0, %v290_v14  ;;  %1156 = vmatmul.mubr.msk.f32.vlgmr.msra.gmra.mrb[0].mxu0 %vm309_vm0, %v283_v12  ;;  %v285_v20 = vld [vmem:[%s1377_s19 + $0x18] sm:$0xff]  ;;  %v286_v21 = vld [vmem:[%s1377_s19 + $0x20] sm:$0xff]  ;;  %v287_v25 = vld [vmem:[%s1377_s19 + $0x28] sm:$0xff] }
  0x13   : > { %1158 = vmatprep.mubr.msk.f32.mxu0 %vm309_vm0, %v284_v13  ;;  %1168 = vmatmul.mubr.msk.f32.vlgmr.msra.gmra.mrb[0].mxu1 %vm309_vm0, %v291_v15  ;;  %v293_v22 = vld [vmem:[%s1377_s19 + $0x58] sm:$0xff]  ;;  %v294_v23 = vld [vmem:[%s1377_s19 + $0x60] sm:$0xff]  ;;  %v288_v26 = vld [vmem:[%s1377_s19 + $0x30] sm:$0xff] }
  0x14   : > { %1170 = vmatprep.mubr.msk.f32.mxu1 %vm309_vm0, %v292_v16  ;;  %1262 = vmatpush3.bf16.msra.mxu1 %v1259_v8  ;;  %v295_v27 = vld [vmem:[%s1377_s19 + $0x68] sm:$0xff]  ;;  %v296_v28 = vld [vmem:[%s1377_s19 + $0x70] sm:$0xff]  ;;  %v289_v29 = vld [vmem:[%s1377_s19 + $0x38] sm:$0xff] }
  0x15   : > { %1264 = vmatprep.subr.bf16.mxu1 %v1263_v17  ;;  %v297_v30 = vld [vmem:[%s1377_s19 + $0x78] sm:$0xff]  ;;  %1278 = vmatpush3.bf16.msra.mxu0 %v1275_v37 }
  0x16   : > { %1159 = vmatmul.mubr.msk.f32.gmra.mrb[2].mxu0 %vm309_vm0, %v285_v20  ;;  %1280 = vmatprep.subr.bf16.mxu0 %v1279_v39 }
  0x17   : > { %1161 = vmatprep.mubr.msk.f32.mxu0 %vm309_vm0, %v286_v21  ;;  %1171 = vmatmul.mubr.msk.f32.gmra.mrb[2].mxu1 %vm309_vm0, %v293_v22 }
  0x18   : > { %1173 = vmatprep.mubr.msk.f32.mxu1 %vm309_vm0, %v294_v23  ;;  %1266 = vmatpush3.bf16.msra.mxu1 %v1263_v17 }
  0x19   : > { %1268 = vmatprep.subr.bf16.mxu1 %v1267_v24  ;;  %1282 = vmatpush3.bf16.msra.mxu0 %v1279_v39 }
  0x1a   : > { %1162 = vmatmul.mubr.msk.f32.gmra.mrb[4].mxu0 %vm309_vm0, %v287_v25  ;;  %v1047_v25 = vld [vmem:[%s1528_s4] ss:$0 sm:$0xff] }
  0x1b   : > { %1164 = vmatprep.mubr.msk.f32.mxu0 %vm309_vm0, %v288_v26  ;;  %1174 = vmatmul.mubr.msk.f32.gmra.mrb[4].mxu1 %vm309_vm0, %v295_v27 }
  0x1c   : > { %1176 = vmatprep.mubr.msk.f32.mxu1 %vm309_vm0, %v296_v28  ;;  %1270 = vmatpush3.bf16.msra.mxu1 %v1267_v24 }
  0x1d   : > { %1272 = vmatprep.subr.bf16.mxu1 %v1271_v33 }
  0x1e   : > { %1165 = vmatmul.mubr.msk.f32.gmra.mrb[6].mxu0 %vm309_vm0, %v289_v29 }
  0x1f   : > { %1177 = vmatmul.mubr.msk.f32.gmra.mrb[6].mxu1 %vm309_vm0, %v297_v30 }
  0x20   : > { %1274 = vmatpush3.bf16.msra.mxu1 %v1271_v33 }
  0xe5   : > { %v1157_v41 = vpop.f32.mrb[0].mxu0 }
  0xe6   : > { %v430_v42 = vadd.f32 %v1157_v41, %v1030_v40  ;;  %v424_v43 = vpop.f32.mrb[1].mxu0  ;;  %v1169_v44 = vpop.f32.mrb[0].mxu1 }
  0xe7   : > { %v425_v45 = vadd.f32 %v1030_v40, %v424_v43  ;;  %v464_v46 = vpop.f32.mrb[1].mxu1  ;;  %v470_v12 = vadd.f32 %v1169_v44, %v1030_v40 }
  0xe8   : > { %v504_v49 = vmax.f32 %v430_v42, 0.0  ;;  %v465_v1 = vadd.f32 %v1030_v40, %v464_v46 }
  0xe9   : > { %v503_v47 = vmax.f32 %v425_v45, 0.0  ;;  %v1160_v48 = vpop.f32.mrb[2].mxu0  ;;  %v512_v15 = vmax.f32 %v470_v12, 0.0 }
  0xea   : > { %v440_v50 = vadd.f32 %v1160_v48, %v1030_v40  ;;  %v434_v51 = vpop.f32.mrb[3].mxu0  ;;  %v1172_v52 = vpop.f32.mrb[2].mxu1  ;;  %v511_v9 = vmax.f32 %v465_v1, 0.0 }
  0xeb   : > { %v435_v53 = vadd.f32 %v1030_v40, %v434_v51  ;;  %1195 = vmatprep.mubr.msk.f32.mxu1 %vm534_vm1, %v503_v47  ;;  %v474_v54 = vpop.f32.mrb[3].mxu1  ;;  %v480_v16 = vadd.f32 %v1172_v52, %v1030_v40 }
  0xec   : > { %1196 = vmatmul.mubr.msk.f32.vlgmr.msra.gmra.mrb[8].mxu1 %vm534_vm1, %v504_v49  ;;  %v506_v57 = vmax.f32 %v440_v50, 0.0  ;;  %v475_v10 = vadd.f32 %v1030_v40, %v474_v54 }
  0xed   : > { %v505_v55 = vmax.f32 %v435_v53, 0.0  ;;  %v1163_v56 = vpop.f32.mrb[4].mxu0  ;;  %v514_v19 = vmax.f32 %v480_v16, 0.0 }
  0xee   : > { %v450_v58 = vadd.f32 %v1163_v56, %v1030_v40  ;;  %v444_v59 = vpop.f32.mrb[5].mxu0  ;;  %v1175_v60 = vpop.f32.mrb[4].mxu1  ;;  %v513_v13 = vmax.f32 %v475_v10, 0.0  ;;  %v1064_v10 = vld [vmem:[%s1530_s6] ss:$0 sm:$0xff] }
  0xef   : > { %v445_v61 = vadd.f32 %v1030_v40, %v444_v59  ;;  %1198 = vmatprep.mubr.msk.f32.mxu1 %vm534_vm1, %v505_v55  ;;  %v484_v62 = vpop.f32.mrb[5].mxu1  ;;  %v490_v20 = vadd.f32 %v1175_v60, %v1030_v40 }
  0xf0   : > { %1199 = vmatmul.mubr.msk.f32.gmra.mrb[10].mxu1 %vm534_vm1, %v506_v57  ;;  %v508_v2 = vmax.f32 %v450_v58, 0.0  ;;  %v485_v14 = vadd.f32 %v1030_v40, %v484_v62 }
  0xf1   : > { %v507_v63 = vmax.f32 %v445_v61, 0.0  ;;  %v1166_v0 = vpop.f32.mrb[6].mxu0  ;;  %v516_v22 = vmax.f32 %v490_v20, 0.0 }
  0xf2   : > { %v460_v3 = vadd.f32 %v1166_v0, %v1030_v40  ;;  %v454_v4 = vpop.f32.mrb[7].mxu0  ;;  %v1178_v5 = vpop.f32.mrb[6].mxu1  ;;  %v515_v17 = vmax.f32 %v485_v14, 0.0 }
  0xf3   : > { %v455_v6 = vadd.f32 %v1030_v40, %v454_v4  ;;  %1201 = vmatprep.mubr.msk.f32.mxu1 %vm534_vm1, %v507_v63  ;;  %v494_v7 = vpop.f32.mrb[7].mxu1  ;;  %v500_v23 = vadd.f32 %v1178_v5, %v1030_v40 }
  0xf4   : > { %1202 = vmatmul.mubr.msk.f32.gmra.mrb[12].mxu1 %vm534_vm1, %v508_v2  ;;  %v510_v11 = vmax.f32 %v460_v3, 0.0  ;;  %v495_v18 = vadd.f32 %v1030_v40, %v494_v7 }
  0xf5   : > { %v509_v8 = vmax.f32 %v455_v6, 0.0  ;;  %v518_v24 = vmax.f32 %v500_v23, 0.0 }
  0xf6   : > { %v517_v21 = vmax.f32 %v495_v18, 0.0 }
  0xf7   : > { %1204 = vmatprep.mubr.msk.f32.mxu1 %vm534_vm1, %v509_v8 }
  0xf8   : > { %1205 = vmatmul.mubr.msk.f32.gmra.mrb[14].mxu1 %vm534_vm1, %v510_v11 }
  0xf9   : > { %1207 = vmatprep.mubr.msk.f32.mxu1 %vm534_vm1, %v511_v9 }
  0xfc   : > { %1208 = vmatmul.mubr.msk.f32.gmra.mrb[16].mxu1 %vm534_vm1, %v512_v15 }
  0xfd   : > { %1210 = vmatprep.mubr.msk.f32.mxu1 %vm534_vm1, %v513_v13 }
 0x100   : > { %1211 = vmatmul.mubr.msk.f32.gmra.mrb[18].mxu1 %vm534_vm1, %v514_v19 }
 0x101   : > { %1213 = vmatprep.mubr.msk.f32.mxu1 %vm534_vm1, %v515_v17 }
 0x104   : > { %1214 = vmatmul.mubr.msk.f32.gmra.mrb[20].mxu1 %vm534_vm1, %v516_v22 }
 0x105   : > { %1216 = vmatprep.mubr.msk.f32.mxu1 %vm534_vm1, %v517_v21 }
 0x108   : > { %1217 = vmatmul.mubr.msk.f32.gmra.mrb[22].mxu1 %vm534_vm1, %v518_v24 }
 0x1bf   : > { %v1197_v26 = vpop.f32.mrb[8].mxu1 }
 0x1c0   : > { %v655_v27 = vadd.f32 %v1197_v26, %v1047_v25  ;;  %v649_v28 = vpop.f32.mrb[9].mxu1 }
 0x1c1   : > { %v650_v29 = vadd.f32 %v1047_v25, %v649_v28 }
 0x1c2   : > { %v729_v32 = vmax.f32 %v655_v27, 0.0 }
 0x1c3   : > { %v728_v30 = vmax.f32 %v650_v29, 0.0  ;;  %v1200_v31 = vpop.f32.mrb[10].mxu1 }
 0x1c4   : > { %v665_v33 = vadd.f32 %v1200_v31, %v1047_v25  ;;  %v659_v34 = vpop.f32.mrb[11].mxu1 }
 0x1c5   : > { %v660_v35 = vadd.f32 %v1047_v25, %v659_v34  ;;  %1227 = vmatprep.mubr.msk.f32.mxu0 %vm309_vm0, %v728_v30 }
 0x1c6   : > { %1228 = vmatmul.mubr.msk.f32.vlgmr.msra.gmra.mrb[8].mxu0 %vm309_vm0, %v729_v32  ;;  %v731_v38 = vmax.f32 %v665_v33, 0.0 }
 0x1c7   : > { %v730_v36 = vmax.f32 %v660_v35, 0.0  ;;  %v1203_v37 = vpop.f32.mrb[12].mxu1 }
 0x1c8   : > { %v675_v39 = vadd.f32 %v1203_v37, %v1047_v25  ;;  %v669_v40 = vpop.f32.mrb[13].mxu1 }
 0x1c9   : > { %v670_v41 = vadd.f32 %v1047_v25, %v669_v40  ;;  %1230 = vmatprep.mubr.msk.f32.mxu0 %vm309_vm0, %v730_v36 }
 0x1ca   : > { %1231 = vmatmul.mubr.msk.f32.gmra.mrb[10].mxu0 %vm309_vm0, %v731_v38  ;;  %v733_v44 = vmax.f32 %v675_v39, 0.0 }
 0x1cb   : > { %v732_v42 = vmax.f32 %v670_v41, 0.0  ;;  %v1206_v43 = vpop.f32.mrb[14].mxu1 }
 0x1cc   : > { %v685_v45 = vadd.f32 %v1206_v43, %v1047_v25  ;;  %v679_v46 = vpop.f32.mrb[15].mxu1 }
 0x1cd   : > { %v680_v47 = vadd.f32 %v1047_v25, %v679_v46  ;;  %1233 = vmatprep.mubr.msk.f32.mxu0 %vm309_vm0, %v732_v42 }
 0x1ce   : > { %1234 = vmatmul.mubr.msk.f32.gmra.mrb[12].mxu0 %vm309_vm0, %v733_v44  ;;  %v735_v50 = vmax.f32 %v685_v45, 0.0 }
 0x1cf   : > { %v734_v48 = vmax.f32 %v680_v47, 0.0  ;;  %v1209_v49 = vpop.f32.mrb[16].mxu1 }
 0x1d0   : > { %v695_v51 = vadd.f32 %v1209_v49, %v1047_v25  ;;  %v689_v52 = vpop.f32.mrb[17].mxu1 }
 0x1d1   : > { %v690_v53 = vadd.f32 %v1047_v25, %v689_v52  ;;  %1236 = vmatprep.mubr.msk.f32.mxu0 %vm309_vm0, %v734_v48 }
 0x1d2   : > { %1237 = vmatmul.mubr.msk.f32.gmra.mrb[14].mxu0 %vm309_vm0, %v735_v50  ;;  %v737_v56 = vmax.f32 %v695_v51, 0.0 }
 0x1d3   : > { %v736_v54 = vmax.f32 %v690_v53, 0.0  ;;  %v1212_v55 = vpop.f32.mrb[18].mxu1 }
 0x1d4   : > { %v705_v57 = vadd.f32 %v1212_v55, %v1047_v25  ;;  %v699_v58 = vpop.f32.mrb[19].mxu1 }
 0x1d5   : > { %v700_v59 = vadd.f32 %v1047_v25, %v699_v58  ;;  %1239 = vmatprep.mubr.msk.f32.mxu0 %vm309_vm0, %v736_v54 }
 0x1d6   : > { %1240 = vmatmul.mubr.msk.f32.gmra.mrb[16].mxu0 %vm309_vm0, %v737_v56  ;;  %v739_v62 = vmax.f32 %v705_v57, 0.0 }
 0x1d7   : > { %v738_v60 = vmax.f32 %v700_v59, 0.0  ;;  %v1215_v61 = vpop.f32.mrb[20].mxu1 }
 0x1d8   : > { %v715_v63 = vadd.f32 %v1215_v61, %v1047_v25  ;;  %v709_v0 = vpop.f32.mrb[21].mxu1 }
 0x1d9   : > { %v710_v1 = vadd.f32 %v1047_v25, %v709_v0  ;;  %1242 = vmatprep.mubr.msk.f32.mxu0 %vm309_vm0, %v738_v60 }
 0x1da   : > { %1243 = vmatmul.mubr.msk.f32.gmra.mrb[18].mxu0 %vm309_vm0, %v739_v62  ;;  %v741_v4 = vmax.f32 %v715_v63, 0.0 }
 0x1db   : > { %v740_v2 = vmax.f32 %v710_v1, 0.0  ;;  %v1218_v3 = vpop.f32.mrb[22].mxu1 }
 0x1dc   : > { %v725_v5 = vadd.f32 %v1218_v3, %v1047_v25  ;;  %v719_v6 = vpop.f32.mrb[23].mxu1 }
 0x1dd   : > { %v720_v7 = vadd.f32 %v1047_v25, %v719_v6  ;;  %1245 = vmatprep.mubr.msk.f32.mxu0 %vm309_vm0, %v740_v2 }
 0x1de   : > { %1246 = vmatmul.mubr.msk.f32.gmra.mrb[20].mxu0 %vm309_vm0, %v741_v4  ;;  %v743_v9 = vmax.f32 %v725_v5, 0.0 }
 0x1df   : > { %v742_v8 = vmax.f32 %v720_v7, 0.0 }
 0x1e1   : > { %1248 = vmatprep.mubr.msk.f32.mxu0 %vm309_vm0, %v742_v8 }
 0x1e2   : > { %1249 = vmatmul.mubr.msk.f32.gmra.mrb[22].mxu0 %vm309_vm0, %v743_v9 }
 0x299   : > { %v1229_v11 = vpop.f32.mrb[8].mxu0 }
 0x29a   : > { %v875_v12 = vadd.f32 %v1229_v11, %v1064_v10  ;;  %v869_v13 = vpop.f32.mrb[9].mxu0 }
 0x29b   : > { %v870_v14 = vadd.f32 %v1064_v10, %v869_v13 }
 0x29c   : > { %950 = vst.msk [vmem:[%s1487_s29 + $0x8] sm:$0xff] %vm948_vm2, %v875_v12 }
 0x29d   : > { %949 = vst.msk [vmem:[%s1487_s29] sm:$0xff] %vm948_vm2, %v870_v14  ;;  %v1232_v15 = vpop.f32.mrb[10].mxu0 }
 0x29e   : > { %v885_v16 = vadd.f32 %v1232_v15, %v1064_v10  ;;  %v879_v17 = vpop.f32.mrb[11].mxu0 }
 0x29f   : > { %v880_v18 = vadd.f32 %v1064_v10, %v879_v17 }
 0x2a0   : > { %952 = vst.msk [vmem:[%s1487_s29 + $0x18] sm:$0xff] %vm948_vm2, %v885_v16 }
 0x2a1   : > { %951 = vst.msk [vmem:[%s1487_s29 + $0x10] sm:$0xff] %vm948_vm2, %v880_v18  ;;  %v1235_v19 = vpop.f32.mrb[12].mxu0 }
 0x2a2   : > { %v895_v20 = vadd.f32 %v1235_v19, %v1064_v10  ;;  %v889_v21 = vpop.f32.mrb[13].mxu0 }
 0x2a3   : > { %v890_v22 = vadd.f32 %v1064_v10, %v889_v21 }
 0x2a4   : > { %954 = vst.msk [vmem:[%s1487_s29 + $0x28] sm:$0xff] %vm948_vm2, %v895_v20 }
 0x2a5   : > { %953 = vst.msk [vmem:[%s1487_s29 + $0x20] sm:$0xff] %vm948_vm2, %v890_v22  ;;  %v1238_v23 = vpop.f32.mrb[14].mxu0 }
 0x2a6   : > { %v905_v24 = vadd.f32 %v1238_v23, %v1064_v10  ;;  %v899_v25 = vpop.f32.mrb[15].mxu0 }
 0x2a7   : > { %v900_v26 = vadd.f32 %v1064_v10, %v899_v25 }
 0x2a8   : > { %956 = vst.msk [vmem:[%s1487_s29 + $0x38] sm:$0xff] %vm948_vm2, %v905_v24 }
 0x2a9   : > { %955 = vst.msk [vmem:[%s1487_s29 + $0x30] sm:$0xff] %vm948_vm2, %v900_v26  ;;  %v1241_v27 = vpop.f32.mrb[16].mxu0 }
 0x2aa   : > { %v915_v28 = vadd.f32 %v1241_v27, %v1064_v10  ;;  %v909_v29 = vpop.f32.mrb[17].mxu0 }
 0x2ab   : > { %v910_v30 = vadd.f32 %v1064_v10, %v909_v29 }
 0x2ac   : > { %958 = vst.msk [vmem:[%s1487_s29 + $0x48] sm:$0xff] %vm948_vm2, %v915_v28 }
 0x2ad   : > { %957 = vst.msk [vmem:[%s1487_s29 + $0x40] sm:$0xff] %vm948_vm2, %v910_v30  ;;  %v1244_v31 = vpop.f32.mrb[18].mxu0 }
 0x2ae   : > { %v925_v32 = vadd.f32 %v1244_v31, %v1064_v10  ;;  %v919_v33 = vpop.f32.mrb[19].mxu0 }
 0x2af   : > { %v920_v34 = vadd.f32 %v1064_v10, %v919_v33 }
 0x2b0   : > { %960 = vst.msk [vmem:[%s1487_s29 + $0x58] sm:$0xff] %vm948_vm2, %v925_v32 }
 0x2b1   : > { %959 = vst.msk [vmem:[%s1487_s29 + $0x50] sm:$0xff] %vm948_vm2, %v920_v34  ;;  %v1247_v35 = vpop.f32.mrb[20].mxu0 }
 0x2b2   : > { %v935_v36 = vadd.f32 %v1247_v35, %v1064_v10  ;;  %v929_v37 = vpop.f32.mrb[21].mxu0 }
 0x2b3   : > { %v930_v38 = vadd.f32 %v1064_v10, %v929_v37 }
 0x2b4   : > { %962 = vst.msk [vmem:[%s1487_s29 + $0x68] sm:$0xff] %vm948_vm2, %v935_v36 }
 0x2b5   : > { %961 = vst.msk [vmem:[%s1487_s29 + $0x60] sm:$0xff] %vm948_vm2, %v930_v38  ;;  %v1250_v39 = vpop.f32.mrb[22].mxu0 }
 0x2b6   : > { %v945_v40 = vadd.f32 %v1250_v39, %v1064_v10  ;;  %v939_v41 = vpop.f32.mrb[23].mxu0 }
 0x2b7   : > { %v940_v42 = vadd.f32 %v1064_v10, %v939_v41 }
 0x2b8   : > { %964 = vst.msk [vmem:[%s1487_s29 + $0x78] sm:$0xff] %vm948_vm2, %v945_v40 }
 0x2b9   : > { %963 = vst.msk [vmem:[%s1487_s29 + $0x70] sm:$0xff] %vm948_vm2, %v940_v42 }
 0x2ba PF: > { %s17_s24 = sadd.s32 1, %s1301_s24  }
 0x2bb   : > { %p14_p4 = scmp.ge.s32.totalorder %s17_s24, 4  }
 0x2bd   :  { %16 = sbr.rel (!%p14_p4) target bundleno = 1 (0x1), region = 78 }

</bundles_post_ra>
